<compile_context>
chip_gen: v6e
topology: v6e:2x2x1
jax: 0.10.0
libtpu: 0.0.40
codegen_flags: <defaults>
</compile_context>

<pallas_src>
import math
import functools

import jax
import jax.numpy as jnp
from jax.experimental import pallas as pl
from jax.experimental.pallas import tpu as pltpu


def _round_up(x: int, m: int) -> int:
    return ((x + m - 1) // m) * m


def _use_bf16_tanh() -> bool:
    """bf16 EUP tanh only on v6e/v7x; keep f32 tanh elsewhere (v5e has no bf16 EUP)."""
    try:
        kind = jax.devices()[0].device_kind.lower()
    except Exception:
        return False
    return any(t in kind for t in ("v6", "v7", "7x"))


def _predict_mlp_kernel(x_ref, w1_ref, b1_ref, wh_ref, bh_ref, w6_ref, b6_ref,
                        o_ref, *, bf16_tanh: bool):
    # x_ref: (TM, base*pack) bf16 packed rows. Weights are (in, out) bf16,
    # block-diagonal over the pack factor; biases f32 (BN already folded in).
    def act(acc_f32):
        if bf16_tanh:
            return jnp.tanh(acc_f32.astype(jnp.bfloat16))
        return jnp.tanh(acc_f32).astype(jnp.bfloat16)

    x = x_ref[...]

    # Layer 1 (single fused matmul over the packed concat rows).
    acc = jnp.dot(x, w1_ref[...], preferred_element_type=jnp.float32) + b1_ref[...]
    h = act(acc)

    # Layers 2..5: four hidden layers, stacked in one (4, Hp, Hp) operand.
    for l in range(4):
        acc = jnp.dot(h, wh_ref[l], preferred_element_type=jnp.float32) + bh_ref[l]
        h = act(acc)

    # Final projection back to (packed) state_channels.
    out = jnp.dot(h, w6_ref[...], preferred_element_type=jnp.float32) + b6_ref[...]
    o_ref[...] = out.astype(o_ref.dtype)


def init_predict_params(key, state_channels: int, action_channels: int):
    """Linear params (nn.Linear default init) + non-trivial eval-mode BN stats."""
    base = state_channels + action_channels
    hidden = base * 2
    dims = [(base, hidden)] + [(hidden, hidden)] * 4 + [(hidden, state_channels)]
    layers = []
    for idx, (fan_in, fan_out) in enumerate(dims):
        key, kw, kb = jax.random.split(key, 3)
        bound = 1.0 / math.sqrt(fan_in)
        layer = {
            "w": jax.random.uniform(kw, (fan_in, fan_out), jnp.float32, -bound, bound),
            "b": jax.random.uniform(kb, (fan_out,), jnp.float32, -bound, bound),
        }
        if idx < 5:  # BatchNorm1d after every hidden Linear
            key, kg, kbeta, km, kv = jax.random.split(key, 5)
            layer["gamma"] = jax.random.uniform(kg, (fan_out,), jnp.float32, 0.5, 1.5)
            layer["beta"] = jax.random.uniform(kbeta, (fan_out,), jnp.float32, -0.1, 0.1)
            layer["mean"] = jax.random.uniform(km, (fan_out,), jnp.float32, -0.1, 0.1)
            layer["var"] = jax.random.uniform(kv, (fan_out,), jnp.float32, 0.5, 1.5)
        layers.append(layer)
    return layers


def prepare_kernel_params(params, state_channels: int, action_channels: int,
                          eps: float = 1e-5):
    """Fold eval-mode BN into the Linears, build block-diagonal weights that pack
    `pack` logical rows per 128-lane register row, zero-pad the packed hidden
    width to a multiple of 128, stack the 4 hidden layers, and cast weights to
    bf16 (biases stay f32)."""
    Sc, Ac = state_channels, action_channels
    base = Sc + Ac
    hidden = 2 * base
    pack = max(1, 128 // hidden)                 # logical rows per packed row
    Hp = _round_up(hidden * pack, 128)
    pad_h = Hp - hidden * pack

    folded = []
    for layer in params:
        w, b = layer["w"], layer["b"]
        if "gamma" in layer:
            scale = layer["gamma"] / jnp.sqrt(layer["var"] + eps)
            w = w * scale[None, :]
            b = (b - layer["mean"]) * scale + layer["beta"]
        folded.append((w, b))

    def bd(w):   # block_diag(W, ..., W) over the pack factor
        return jax.scipy.linalg.block_diag(*([w] * pack))

    def tb(b):   # tile bias over the pack factor
        return jnp.tile(b, pack)

    w1 = jnp.pad(bd(folded[0][0]), ((0, 0), (0, pad_h)))              # (base*pack, Hp)
    b1 = jnp.pad(tb(folded[0][1]), ((0, pad_h),)).reshape(1, Hp)

    wh = jnp.stack([jnp.pad(bd(folded[i][0]), ((0, pad_h), (0, pad_h)))
                    for i in range(1, 5)])                            # (4, Hp, Hp)
    bh = jnp.stack([jnp.pad(tb(folded[i][1]), ((0, pad_h),)).reshape(1, Hp)
                    for i in range(1, 5)])                            # (4, 1, Hp)

    w6 = jnp.pad(bd(folded[5][0]), ((0, pad_h), (0, 0)))              # (Hp, Sc*pack)
    b6 = tb(folded[5][1]).reshape(1, Sc * pack)

    return {
        "w1": w1.astype(jnp.bfloat16), "b1": b1,
        "wh": wh.astype(jnp.bfloat16), "bh": bh,
        "w6": w6.astype(jnp.bfloat16), "b6": b6,
        "pack": pack, "Hp": Hp,
    }


def predict_net_forward(state, actions, kernel_params,
                        state_channels: int, action_channels: int,
                        *, row_tile: int = 2048):
    Sc, Ac = state_channels, action_channels
    base = Sc + Ac
    pack = kernel_params["pack"]
    Hp = kernel_params["Hp"]
    w1, b1 = kernel_params["w1"], kernel_params["b1"]
    wh, bh = kernel_params["wh"], kernel_params["bh"]
    w6, b6 = kernel_params["w6"], kernel_params["b6"]

    # Match the PyTorch broadcast: state (..., Sc) expanded over the action axis.
    if state.ndim < actions.ndim:
        tgt = state.shape[:-1] + (actions.shape[-2], Sc)
        state = jnp.broadcast_to(state[..., None, :], tgt)

    # Pack `pack` logical rows per kernel row (contiguous reshape), bf16 in HBM.
    x = jnp.concatenate([state, actions], axis=-1).astype(jnp.bfloat16)
    lead = x.shape[:-1]
    n_rows = math.prod(lead)
    x = x.reshape(n_rows, base)
    n_pad = _round_up(max(n_rows, 1), pack)
    if n_pad > n_rows:
        x = jnp.pad(x, ((0, n_pad - n_rows), (0, 0)))
    n2 = n_pad // pack
    xp = x.reshape(n2, base * pack)

    # Row tile: big enough to amortize per-step overhead, multiple of 8, and
    # capped so the grid has >=2 steps when possible (v7x dual-TC sharding).
    tile = max(8, min(_round_up(row_tile, 8), _round_up(pl.cdiv(n2, 2), 8)))
    grid = (pl.cdiv(n2, tile),)

    in_specs = [
        pl.BlockSpec((tile, base * pack), lambda i: (i, 0)),   # packed input rows
        pl.BlockSpec((base * pack, Hp), lambda i: (0, 0)),     # W1 (block-diag)
        pl.BlockSpec((1, Hp), lambda i: (0, 0)),               # b1 (BN folded)
        pl.BlockSpec((4, Hp, Hp), lambda i: (0, 0, 0)),        # stacked hidden W
        pl.BlockSpec((4, 1, Hp), lambda i: (0, 0, 0)),         # stacked hidden b
        pl.BlockSpec((Hp, Sc * pack), lambda i: (0, 0)),       # W6 (block-diag)
        pl.BlockSpec((1, Sc * pack), lambda i: (0, 0)),        # b6
    ]
    out_spec = pl.BlockSpec((tile, Sc * pack), lambda i: (i, 0))

    kernel = functools.partial(_predict_mlp_kernel, bf16_tanh=_use_bf16_tanh())

    out = pl.pallas_call(
        kernel,
        out_shape=jax.ShapeDtypeStruct((n2, Sc * pack), jnp.float32),
        grid_spec=pltpu.PrefetchScalarGridSpec(
            num_scalar_prefetch=0,
            grid=grid,
            in_specs=in_specs,
            out_specs=out_spec,
        ),
        compiler_params=pltpu.CompilerParams(
            dimension_semantics=("parallel",)),
    )(xp, w1, b1, wh, bh, w6, b6)

    out = out.reshape(n_pad, Sc)[:n_rows]
    return out.reshape(lead + (Sc,))


def _reference_forward(state, actions, params, eps: float = 1e-5):
    """Pure-JAX f32 reference of PredictNet.forward (eval-mode BatchNorm)."""
    if state.ndim < actions.ndim:
        tgt = state.shape[:-1] + (actions.shape[-2], state.shape[-1])
        state = jnp.broadcast_to(state[..., None, :], tgt)
    h = jnp.concatenate([state, actions], axis=-1).astype(jnp.float32)
    for layer in params:
        h = h @ layer["w"] + layer["b"]
        if "gamma" in layer:
            h = (h - layer["mean"]) / jnp.sqrt(layer["var"] + eps) \
                * layer["gamma"] + layer["beta"]
            h = jnp.tanh(h)
    return h


if __name__ == "__main__":
    key = jax.random.PRNGKey(0)

    state_channels, action_channels = 12, 20    # base = 32, hidden = 64 -> pack = 2
    B, A = 2, 8                                 # batch, candidate actions per batch

    kp, ks, ka = jax.random.split(key, 3)
    params = init_predict_params(kp, state_channels, action_channels)
    kernel_params = prepare_kernel_params(params, state_channels, action_channels)

    state = jax.random.normal(ks, (B, state_channels), jnp.float32)
    actions = jax.random.normal(ka, (B, A, action_channels), jnp.float32)

    out = predict_net_forward(state, actions, kernel_params,
                              state_channels, action_channels)
    out = jax.block_until_ready(out)

    ref = _reference_forward(state, actions, params)
    assert out.shape == (B, A, state_channels), out.shape
    max_err = float(jnp.max(jnp.abs(out - ref)))
    # bf16 matmul operands (and bf16 tanh on v6e/v7x) => loosened tolerance.
    assert jnp.allclose(out, ref, atol=5e-2, rtol=5e-2), max_err

    print("KERNEL_OK")
</pallas_src>

<mosaic_0001>
module attributes {stable_mosaic.version = 11 : i64} {
  func.func @_predict_mlp_kernel(%arg0: i32, %arg1: memref<8x64xbf16, #tpu.memory_space<vmem>>, %arg2: memref<64x128xbf16, #tpu.memory_space<vmem>>, %arg3: memref<1x128xf32, #tpu.memory_space<vmem>>, %arg4: memref<4x128x128xbf16, #tpu.memory_space<vmem>>, %arg5: memref<4x1x128xf32, #tpu.memory_space<vmem>>, %arg6: memref<128x24xbf16, #tpu.memory_space<vmem>>, %arg7: memref<1x24xf32, #tpu.memory_space<vmem>>, %arg8: memref<8x24xf32, #tpu.memory_space<vmem>>) attributes {dimension_semantics = [#tpu.dimension_semantics<parallel>], iteration_bounds = array<i64: 1>, scalar_prefetch = 0 : i64, scratch_operands = 0 : i64, tpu.core_type = #tpu.core_type<tc>, window_params = [{transform_indices = @transform_0, window_bounds = array<i64: 8, 64>}, {pipeline_mode = #tpu.pipeline_mode<synchronous>, transform_indices = @transform_1, window_bounds = array<i64: 64, 128>}, {pipeline_mode = #tpu.pipeline_mode<synchronous>, transform_indices = @transform_2, window_bounds = array<i64: 1, 128>}, {pipeline_mode = #tpu.pipeline_mode<synchronous>, transform_indices = @transform_3, window_bounds = array<i64: 4, 128, 128>}, {pipeline_mode = #tpu.pipeline_mode<synchronous>, transform_indices = @transform_4, window_bounds = array<i64: 4, 1, 128>}, {pipeline_mode = #tpu.pipeline_mode<synchronous>, transform_indices = @transform_5, window_bounds = array<i64: 128, 24>}, {pipeline_mode = #tpu.pipeline_mode<synchronous>, transform_indices = @transform_6, window_bounds = array<i64: 1, 24>}, {transform_indices = @transform_7, window_bounds = array<i64: 8, 24>}]} {
    %c0 = arith.constant 0 : index
    %c0_0 = arith.constant 0 : index
    %0 = vector.load %arg1[%c0, %c0_0] : memref<8x64xbf16, #tpu.memory_space<vmem>>, vector<8x64xbf16>
    %c0_1 = arith.constant 0 : index
    %c0_2 = arith.constant 0 : index
    %1 = vector.load %arg2[%c0_1, %c0_2] : memref<64x128xbf16, #tpu.memory_space<vmem>>, vector<64x128xbf16>
    %cst = arith.constant dense<0.000000e+00> : vector<8x128xf32>
    %2 = tpu.matmul %0, %1, %cst {dimension_numbers = #tpu.dot_dimension_numbers<[1], [0], [0], [1], [0, 0, 1, 1], [], []>} : vector<8x64xbf16>, vector<64x128xbf16>, vector<8x128xf32> -> vector<8x128xf32>
    %c0_3 = arith.constant 0 : index
    %c0_4 = arith.constant 0 : index
    %3 = vector.load %arg3[%c0_3, %c0_4] : memref<1x128xf32, #tpu.memory_space<vmem>>, vector<1x128xf32>
    %4 = vector.broadcast %3 : vector<1x128xf32> to vector<8x128xf32>
    %5 = arith.addf %2, %4 : vector<8x128xf32>
    %6 = math.tanh %5 : vector<8x128xf32>
    %7 = arith.truncf %6 : vector<8x128xf32> to vector<8x128xbf16>
    %c0_5 = arith.constant 0 : index
    %c0_6 = arith.constant 0 : index
    %c0_7 = arith.constant 0 : index
    %8 = vector.load %arg4[%c0_5, %c0_6, %c0_7] : memref<4x128x128xbf16, #tpu.memory_space<vmem>>, vector<1x128x128xbf16>
    %9 = vector.shape_cast %8 : vector<1x128x128xbf16> to vector<128x128xbf16>
    %cst_8 = arith.constant dense<0.000000e+00> : vector<8x128xf32>
    %10 = tpu.matmul %7, %9, %cst_8 {dimension_numbers = #tpu.dot_dimension_numbers<[1], [0], [0], [1], [0, 0, 1, 1], [], []>} : vector<8x128xbf16>, vector<128x128xbf16>, vector<8x128xf32> -> vector<8x128xf32>
    %c0_9 = arith.constant 0 : index
    %c0_10 = arith.constant 0 : index
    %c0_11 = arith.constant 0 : index
    %11 = vector.load %arg5[%c0_9, %c0_10, %c0_11] : memref<4x1x128xf32, #tpu.memory_space<vmem>>, vector<1x1x128xf32>
    %12 = vector.shape_cast %11 : vector<1x1x128xf32> to vector<1x128xf32>
    %13 = vector.broadcast %12 : vector<1x128xf32> to vector<8x128xf32>
    %14 = arith.addf %10, %13 : vector<8x128xf32>
    %15 = math.tanh %14 : vector<8x128xf32>
    %16 = arith.truncf %15 : vector<8x128xf32> to vector<8x128xbf16>
    %c1 = arith.constant 1 : index
    %c0_12 = arith.constant 0 : index
    %c0_13 = arith.constant 0 : index
    %17 = vector.load %arg4[%c1, %c0_12, %c0_13] : memref<4x128x128xbf16, #tpu.memory_space<vmem>>, vector<1x128x128xbf16>
    %18 = vector.shape_cast %17 : vector<1x128x128xbf16> to vector<128x128xbf16>
    %cst_14 = arith.constant dense<0.000000e+00> : vector<8x128xf32>
    %19 = tpu.matmul %16, %18, %cst_14 {dimension_numbers = #tpu.dot_dimension_numbers<[1], [0], [0], [1], [0, 0, 1, 1], [], []>} : vector<8x128xbf16>, vector<128x128xbf16>, vector<8x128xf32> -> vector<8x128xf32>
    %c1_15 = arith.constant 1 : index
    %c0_16 = arith.constant 0 : index
    %c0_17 = arith.constant 0 : index
    %20 = vector.load %arg5[%c1_15, %c0_16, %c0_17] : memref<4x1x128xf32, #tpu.memory_space<vmem>>, vector<1x1x128xf32>
    %21 = vector.shape_cast %20 : vector<1x1x128xf32> to vector<1x128xf32>
    %22 = vector.broadcast %21 : vector<1x128xf32> to vector<8x128xf32>
    %23 = arith.addf %19, %22 : vector<8x128xf32>
    %24 = math.tanh %23 : vector<8x128xf32>
    %25 = arith.truncf %24 : vector<8x128xf32> to vector<8x128xbf16>
    %c2 = arith.constant 2 : index
    %c0_18 = arith.constant 0 : index
    %c0_19 = arith.constant 0 : index
    %26 = vector.load %arg4[%c2, %c0_18, %c0_19] : memref<4x128x128xbf16, #tpu.memory_space<vmem>>, vector<1x128x128xbf16>
    %27 = vector.shape_cast %26 : vector<1x128x128xbf16> to vector<128x128xbf16>
    %cst_20 = arith.constant dense<0.000000e+00> : vector<8x128xf32>
    %28 = tpu.matmul %25, %27, %cst_20 {dimension_numbers = #tpu.dot_dimension_numbers<[1], [0], [0], [1], [0, 0, 1, 1], [], []>} : vector<8x128xbf16>, vector<128x128xbf16>, vector<8x128xf32> -> vector<8x128xf32>
    %c2_21 = arith.constant 2 : index
    %c0_22 = arith.constant 0 : index
    %c0_23 = arith.constant 0 : index
    %29 = vector.load %arg5[%c2_21, %c0_22, %c0_23] : memref<4x1x128xf32, #tpu.memory_space<vmem>>, vector<1x1x128xf32>
    %30 = vector.shape_cast %29 : vector<1x1x128xf32> to vector<1x128xf32>
    %31 = vector.broadcast %30 : vector<1x128xf32> to vector<8x128xf32>
    %32 = arith.addf %28, %31 : vector<8x128xf32>
    %33 = math.tanh %32 : vector<8x128xf32>
    %34 = arith.truncf %33 : vector<8x128xf32> to vector<8x128xbf16>
    %c3 = arith.constant 3 : index
    %c0_24 = arith.constant 0 : index
    %c0_25 = arith.constant 0 : index
    %35 = vector.load %arg4[%c3, %c0_24, %c0_25] : memref<4x128x128xbf16, #tpu.memory_space<vmem>>, vector<1x128x128xbf16>
    %36 = vector.shape_cast %35 : vector<1x128x128xbf16> to vector<128x128xbf16>
    %cst_26 = arith.constant dense<0.000000e+00> : vector<8x128xf32>
    %37 = tpu.matmul %34, %36, %cst_26 {dimension_numbers = #tpu.dot_dimension_numbers<[1], [0], [0], [1], [0, 0, 1, 1], [], []>} : vector<8x128xbf16>, vector<128x128xbf16>, vector<8x128xf32> -> vector<8x128xf32>
    %c3_27 = arith.constant 3 : index
    %c0_28 = arith.constant 0 : index
    %c0_29 = arith.constant 0 : index
    %38 = vector.load %arg5[%c3_27, %c0_28, %c0_29] : memref<4x1x128xf32, #tpu.memory_space<vmem>>, vector<1x1x128xf32>
    %39 = vector.shape_cast %38 : vector<1x1x128xf32> to vector<1x128xf32>
    %40 = vector.broadcast %39 : vector<1x128xf32> to vector<8x128xf32>
    %41 = arith.addf %37, %40 : vector<8x128xf32>
    %42 = math.tanh %41 : vector<8x128xf32>
    %43 = arith.truncf %42 : vector<8x128xf32> to vector<8x128xbf16>
    %c0_30 = arith.constant 0 : index
    %c0_31 = arith.constant 0 : index
    %44 = vector.load %arg6[%c0_30, %c0_31] : memref<128x24xbf16, #tpu.memory_space<vmem>>, vector<128x24xbf16>
    %cst_32 = arith.constant dense<0.000000e+00> : vector<8x24xf32>
    %45 = tpu.matmul %43, %44, %cst_32 {dimension_numbers = #tpu.dot_dimension_numbers<[1], [0], [0], [1], [0, 0, 1, 1], [], []>} : vector<8x128xbf16>, vector<128x24xbf16>, vector<8x24xf32> -> vector<8x24xf32>
    %c0_33 = arith.constant 0 : index
    %c0_34 = arith.constant 0 : index
    %46 = vector.load %arg7[%c0_33, %c0_34] : memref<1x24xf32, #tpu.memory_space<vmem>>, vector<1x24xf32>
    %47 = vector.broadcast %46 : vector<1x24xf32> to vector<8x24xf32>
    %48 = arith.addf %45, %47 : vector<8x24xf32>
    %c0_35 = arith.constant 0 : index
    %c0_36 = arith.constant 0 : index
    %49 = vector.load %arg8[%c0_35, %c0_36] : memref<8x24xf32, #tpu.memory_space<vmem>>, vector<8x24xf32>
    tpu.vector_store %arg8[%c0_35, %c0_36], %48 {strides = array<i32>} : memref<8x24xf32, #tpu.memory_space<vmem>>, vector<8x24xf32>,
    return
  }
  func.func @transform_0(%arg0: i32) -> (i32, i32) {
    %c0_i32 = arith.constant 0 : i32
    %c0_i32_0 = arith.constant 0 : i32
    return %arg0, %c0_i32 : i32, i32
  }
  func.func @transform_1(%arg0: i32) -> (i32, i32) {
    %c0_i32 = arith.constant 0 : i32
    %c0_i32_0 = arith.constant 0 : i32
    %c0_i32_1 = arith.constant 0 : i32
    return %c0_i32, %c0_i32_0 : i32, i32
  }
  func.func @transform_2(%arg0: i32) -> (i32, i32) {
    %c0_i32 = arith.constant 0 : i32
    %c0_i32_0 = arith.constant 0 : i32
    %c0_i32_1 = arith.constant 0 : i32
    return %c0_i32, %c0_i32_0 : i32, i32
  }
  func.func @transform_3(%arg0: i32) -> (i32, i32, i32) {
    %c0_i32 = arith.constant 0 : i32
    %c0_i32_0 = arith.constant 0 : i32
    %c0_i32_1 = arith.constant 0 : i32
    %c0_i32_2 = arith.constant 0 : i32
    return %c0_i32, %c0_i32_0, %c0_i32_1 : i32, i32, i32
  }
  func.func @transform_4(%arg0: i32) -> (i32, i32, i32) {
    %c0_i32 = arith.constant 0 : i32
    %c0_i32_0 = arith.constant 0 : i32
    %c0_i32_1 = arith.constant 0 : i32
    %c0_i32_2 = arith.constant 0 : i32
    return %c0_i32, %c0_i32_0, %c0_i32_1 : i32, i32, i32
  }
  func.func @transform_5(%arg0: i32) -> (i32, i32) {
    %c0_i32 = arith.constant 0 : i32
    %c0_i32_0 = arith.constant 0 : i32
    %c0_i32_1 = arith.constant 0 : i32
    return %c0_i32, %c0_i32_0 : i32, i32
  }
  func.func @transform_6(%arg0: i32) -> (i32, i32) {
    %c0_i32 = arith.constant 0 : i32
    %c0_i32_0 = arith.constant 0 : i32
    %c0_i32_1 = arith.constant 0 : i32
    return %c0_i32, %c0_i32_0 : i32, i32
  }
  func.func @transform_7(%arg0: i32) -> (i32, i32) {
    %c0_i32 = arith.constant 0 : i32
    %c0_i32_0 = arith.constant 0 : i32
    return %arg0, %c0_i32 : i32, i32
  }
}

</mosaic_0001>

<bundles_post_ra>
// kernel: tpu_custom_call.1
= control target key start
LH: loop header
LB: loop body
LE: loop exit
PB: predicated region body
PF: predicated region fallthrough
CT: control target
= control target key end

     0   :  { %12 = vsyncpa [#allocation3], 0  ;;  %s1199_s0 = inlined_call_operand.vmem [shape: bf16[8,64], index: 0, kind: input, shape index: {}]   ;;  %s1200_s1 = inlined_call_operand.vmem [shape: bf16[64,128], index: 1, kind: input, shape index: {}]   ;;  %s1201_s2 = inlined_call_operand.vmem [shape: f32[1,128], index: 2, kind: input, shape index: {}]   ;;  %s1202_s3 = inlined_call_operand.hbm [shape: bf16[4,128,128], index: 3, kind: input, shape index: {}]   ;;  %s1203_s4 = inlined_call_operand.vmem [shape: f32[4,1,128], index: 4, kind: input, shape index: {}]   ;;  %s1204_s5 = inlined_call_operand.vmem [shape: bf16[128,24], index: 5, kind: input, shape index: {}]   ;;  %s1205_s6 = inlined_call_operand.vmem [shape: f32[1,24], index: 6, kind: input, shape index: {}]   ;;  %s1206_s7 = inlined_call_operand.hbm [shape: f32[8,24], index: 7, kind: output, shape index: {}]  }
   0x1   :  { %13 = vsyncpa [#allocation4], 0  ;;  %s1034_s24 = smov [#allocation2]  }
   0x2   :  { %s25_s25 = sshll.u32 %s1034_s24, 4  ;;  %s26_s25 = int_to_ptr.vmem [resolvable:$true] %s25_s25 }
   0x3   :  { %s998_s26 = scalar_lea.vmem %s26_s25, 4096  ;;  %p1003_p1 = scmp.lt.s32.totalorder %s26_s25, %s26_s25 }
   0x4   :  { %p999_p0 = scmp.ne.s32.totalorder %s26_s25, %s998_s26  ;;  %p1004_p2 = scmp.lt.s32.totalorder %s998_s26, %s998_s26 }
   0x6   :  { %p1005_p3 = por %p1004_p2, %p1003_p1 }
   0x8   :  { %p1006_p4 = pnand %p1005_p3, %p999_p0 }
   0xa   :  { %1009 = shalt.err (!%p1006_p4)
}
   0xb   :  { %s1035_s27 = smov 64   ;;  %s1036_s28 = smov 4  }
   0xc   :  { %31 = dma.hbm_to_vmem [thread:$0]  %s1202_s3, 4096, %s26_s25, [#allocation3], %s1035_s27, %s1035_s27, %s1036_s28  }
   0xd   :  { %1030 = dma.done.wait [#allocation3], 4096  }
   0xe   :  { %1031 = vsyncadd [#allocation3], 4294963200  ;;  %v1037_v0 = vmov 0.0   ;;  %vm1038_vm0 = vmmov 0   ;;  %v936_v1 = vld [vmem:[%s1200_s1 + $0x18] sm:$0xff]   ;;  %v937_v2 = vld [vmem:[%s1200_s1 + $0x10] sm:$0xff]  }
   0xf   :  { %818 = vmatprep.subr.bf16.mxu0 %v1037_v0  ;;  %826 = vmatprep.mubr.msk.bf16.mxu0 %vm1038_vm0, %v1037_v0  ;;  %v940_v3 = vld [vmem:[#allocation2 + $0x38] sm:$0xff]   ;;  %v938_v4 = vld [vmem:[%s1200_s1 + $0x8] sm:$0xff]   ;;  %vm82_vm1 = vcmask 523264   ;;  %v941_v5 = vld [vmem:[#allocation2 + $0x30] sm:$0xff]   ;;  %vm697_vm2 = vcmask 195584  }
  0x10   :  { %830 = vmatprep.subr.bf16.mxu1 %v1037_v0  ;;  %846 = vmatprep.mubr.msk.bf16.mxu1 %vm1038_vm0, %v1037_v0  ;;  %v939_v6 = vld [vmem:[%s1200_s1] sm:$0xff]   ;;  %v942_v7 = vld [vmem:[#allocation2 + $0x28] sm:$0xff]   ;;  %v944_v10 = vld [vmem:[#allocation2 + $0x18] sm:$0xff]   ;;  %s1039_s1 = smov [#allocation5]  }
  0x11   :  { %819 = vmatpush3.bf16.msra.mxu0 %v936_v1  ;;  %831 = vmatpush3.bf16.msra.mxu1 %v940_v3  ;;  %v42_v8 = vld [vmem:[%s1199_s0] sm:$0xf]  ;;  %v945_v11 = vld [vmem:[#allocation2 + $0x10] sm:$0xff]   ;;  %v946_v12 = vld [vmem:[#allocation2 + $0x8] sm:$0xff]  }
  0x12   :  { %820 = vmatprep.subr.bf16.mxu0 %v1037_v0  ;;  %832 = vmatprep.subr.bf16.mxu1 %v1037_v0  ;;  %v943_v9 = vld [vmem:[#allocation2 + $0x20] sm:$0xff]   ;;  %v948_v14 = vld [vmem:[#allocation2 + $0x78] sm:$0xff]   ;;  %v949_v15 = vld [vmem:[#allocation2 + $0x70] sm:$0xff]  }
  0x13   :  { %v947_v13 = vld [vmem:[#allocation2] sm:$0xff]   ;;  %v950_v16 = vld [vmem:[#allocation2 + $0x68] sm:$0xff]   ;;  %v952_v26 = vld [vmem:[#allocation2 + $0x58] sm:$0xff]  }
  0x14   :  { %v714_v17 = vld [vmem:[%s1201_s2] ss:$0 sm:$0xff]  ;;  %v953_v27 = vld [vmem:[#allocation2 + $0x50] sm:$0xff]   ;;  %v954_v28 = vld [vmem:[#allocation2 + $0x48] sm:$0xff]  }
  0x15   :  { %821 = vmatpush3.bf16.msra.mxu0 %v937_v2  ;;  %833 = vmatpush3.bf16.msra.mxu1 %v941_v5  ;;  %v951_v25 = vld [vmem:[#allocation2 + $0x60] sm:$0xff]   ;;  %v956_v30 = vld [vmem:[#allocation2 + $0xb8] sm:$0xff]   ;;  %v957_v31 = vld [vmem:[#allocation2 + $0xb0] sm:$0xff]  }
  0x16   :  { %822 = vmatprep.subr.bf16.mxu0 %v1037_v0  ;;  %834 = vmatprep.subr.bf16.mxu1 %v1037_v0  ;;  %v955_v29 = vld [vmem:[#allocation2 + $0x40] sm:$0xff]   ;;  %v958_v32 = vld [vmem:[#allocation2 + $0xa8] sm:$0xff]   ;;  %v960_v42 = vld [vmem:[#allocation2 + $0x98] sm:$0xff]  }
  0x17   :  { %v720_v33 = vld [vmem:[%s1203_s4] ss:$0 sm:$0xff]  ;;  %v961_v43 = vld [vmem:[#allocation2 + $0x90] sm:$0xff]   ;;  %v962_v44 = vld [vmem:[#allocation2 + $0x88] sm:$0xff]  }
  0x18   :  { %v959_v41 = vld [vmem:[#allocation2 + $0xa0] sm:$0xff]   ;;  %v964_v46 = vld [vmem:[#allocation2 + $0xf8] sm:$0xff]   ;;  %v965_v47 = vld [vmem:[#allocation2 + $0xf0] sm:$0xff]  }
  0x19   :  { %823 = vmatpush3.bf16.msra.mxu0 %v938_v4  ;;  %835 = vmatpush3.bf16.msra.mxu1 %v942_v7  ;;  %v963_v45 = vld [vmem:[#allocation2 + $0x80] sm:$0xff]   ;;  %v966_v48 = vld [vmem:[#allocation2 + $0xe8] sm:$0xff]   ;;  %v968_v58 = vld [vmem:[#allocation2 + $0xd8] sm:$0xff]  }
  0x1a   :  { %824 = vmatprep.subr.bf16.mxu0 %v1037_v0  ;;  %836 = vmatprep.subr.bf16.mxu1 %v1037_v0  ;;  %v730_v49 = vld [vmem:[%s1203_s4 + $0x1] ss:$0 sm:$0xff]  ;;  %v969_v59 = vld [vmem:[#allocation2 + $0xd0] sm:$0xff]   ;;  %v970_v60 = vld [vmem:[#allocation2 + $0xc8] sm:$0xff]  }
  0x1b   :  { %v967_v57 = vld [vmem:[#allocation2 + $0xe0] sm:$0xff]   ;;  %v972_v62 = vld [vmem:[%s1204_s5 + $0x38] sm:$0xff]   ;;  %v973_v63 = vld [vmem:[%s1204_s5 + $0x30] sm:$0xff]  }
  0x1c   :  { %v971_v61 = vld [vmem:[#allocation2 + $0xc0] sm:$0xff]   ;;  %v974_v1 = vld [vmem:[%s1204_s5 + $0x28] sm:$0xff]  }
  0x1d   :  { %825 = vmatpush3.bf16.msra.mxu0 %v939_v6  ;;  %837 = vmatpush3.bf16.msra.mxu1 %v943_v9  ;;  %v740_v2 = vld [vmem:[%s1203_s4 + $0x2] ss:$0 sm:$0xff] }
  0x1e   :  { %850 = vmatprep.subr.bf16.mxu0 %v1037_v0  ;;  %838 = vmatprep.subr.bf16.mxu1 %v1037_v0 }
  0x20   :  { %827 = vmatmul.mubr.msk.bf16.vlgmr.msra.gmra.mxu0 %vm82_vm1, %v42_v8 }
  0x21   :  { %866 = vmatprep.mubr.msk.bf16.mxu0 %vm1038_vm0, %v1037_v0  ;;  %839 = vmatpush3.bf16.msra.mxu1 %v944_v10  ;;  %v975_v10 = vld [vmem:[%s1204_s5 + $0x20] sm:$0xff]  }
  0x22   :  { %840 = vmatprep.subr.bf16.mxu1 %v1037_v0  ;;  %851 = vmatpush3.bf16.msra.mxu0 %v948_v14  ;;  %v979_v14 = vld [vmem:[%s1204_s5] sm:$0xff]  }
  0x23   :  { %852 = vmatprep.subr.bf16.mxu0 %v1037_v0 }
  0x25   :  { %841 = vmatpush3.bf16.msra.mxu1 %v945_v11  ;;  %v976_v11 = vld [vmem:[%s1204_s5 + $0x18] sm:$0xff]  }
  0x26   :  { %842 = vmatprep.subr.bf16.mxu1 %v1037_v0  ;;  %853 = vmatpush3.bf16.msra.mxu0 %v949_v15  ;;  %v750_v15 = vld [vmem:[%s1203_s4 + $0x3] ss:$0 sm:$0xff] }
  0x27   :  { %854 = vmatprep.subr.bf16.mxu0 %v1037_v0 }
  0x29   :  { %843 = vmatpush3.bf16.msra.mxu1 %v946_v12  ;;  %v977_v12 = vld [vmem:[%s1204_s5 + $0x10] sm:$0xff]  }
  0x2a   :  { %844 = vmatprep.subr.bf16.mxu1 %v1037_v0  ;;  %855 = vmatpush3.bf16.msra.mxu0 %v950_v16 }
  0x2b   :  { %856 = vmatprep.subr.bf16.mxu0 %v1037_v0 }
  0x2d   :  { %845 = vmatpush3.bf16.msra.mxu1 %v947_v13  ;;  %v978_v13 = vld [vmem:[%s1204_s5 + $0x8] sm:$0xff]   ;;  %s705_s5 = sshll.u32 %s1039_s1, 4  ;;  %s706_s5 = int_to_ptr.vmem [resolvable:$true] %s705_s5 }
  0x2e   :  { %870 = vmatprep.subr.bf16.mxu1 %v1037_v0  ;;  %857 = vmatpush3.bf16.msra.mxu0 %v951_v25  ;;  %s1010_s4 = scalar_lea.vmem %s706_s5, 128  ;;  %p1015_p6 = scmp.lt.s32.totalorder %s706_s5, %s706_s5 }
  0x2f   :  { %858 = vmatprep.subr.bf16.mxu0 %v1037_v0  ;;  %p1011_p5 = scmp.ne.s32.totalorder %s706_s5, %s1010_s4  ;;  %p1016_p7 = scmp.lt.s32.totalorder %s1010_s4, %s1010_s4 }
  0x31   :  { %p1017_p8 = por %p1016_p7, %p1015_p6 }
  0x32   :  { %859 = vmatpush3.bf16.msra.mxu0 %v952_v26 }
  0x33   :  { %860 = vmatprep.subr.bf16.mxu0 %v1037_v0  ;;  %p1018_p9 = pnand %p1017_p8, %p1011_p5 }
  0x36   :  { %861 = vmatpush3.bf16.msra.mxu0 %v953_v27 }
  0x37   :  { %862 = vmatprep.subr.bf16.mxu0 %v1037_v0 }
  0x3a   :  { %863 = vmatpush3.bf16.msra.mxu0 %v954_v28 }
  0x3b   :  { %864 = vmatprep.subr.bf16.mxu0 %v1037_v0 }
  0x3e   :  { %865 = vmatpush3.bf16.msra.mxu0 %v955_v29 }
  0x3f   :  { %890 = vmatprep.subr.bf16.mxu0 %v1037_v0 }
  0xe0   :  { %v120_v18 = vpop.f32.mrf.mxu0 }
  0xe1   :  { %v121_v19 = vadd.f32 %v714_v17, %v120_v18 }
  0xe2   :  { %v828_v20 = vpop.f32.mrf.mxu0 }
  0xe3   :  { %980 = vtanh.f32 %v121_v19 }
  0xe4   :  { %v123_v21 = vpop.f32.mrf.mxu0 }
  0xe6   :  { %v829_v22 = vpop.f32.mrf.mxu0 }
  0xf0   :  { %v981_v23 = vpop.eup %980 }
  0xf1   :  { %v127_v24 = vpack.c.bf16 %v981_v23, %v981_v23 }
  0xf3   :  { %847 = vmatmul.mubr.bf16.vlgmr.msra.gmra.mxu1 %v127_v24 }
  0xf4   :  { %886 = vmatprep.mubr.msk.bf16.mxu1 %vm1038_vm0, %v1037_v0  ;;  %871 = vmatpush3.bf16.msra.mxu1 %v956_v30 }
  0xf5   :  { %872 = vmatprep.subr.bf16.mxu1 %v1037_v0 }
  0xf8   :  { %873 = vmatpush3.bf16.msra.mxu1 %v957_v31 }
  0xf9   :  { %874 = vmatprep.subr.bf16.mxu1 %v1037_v0 }
  0xfc   :  { %875 = vmatpush3.bf16.msra.mxu1 %v958_v32 }
  0xfd   :  { %876 = vmatprep.subr.bf16.mxu1 %v1037_v0 }
 0x100   :  { %877 = vmatpush3.bf16.msra.mxu1 %v959_v41 }
 0x101   :  { %878 = vmatprep.subr.bf16.mxu1 %v1037_v0 }
 0x104   :  { %879 = vmatpush3.bf16.msra.mxu1 %v960_v42 }
 0x105   :  { %880 = vmatprep.subr.bf16.mxu1 %v1037_v0 }
 0x108   :  { %881 = vmatpush3.bf16.msra.mxu1 %v961_v43 }
 0x109   :  { %882 = vmatprep.subr.bf16.mxu1 %v1037_v0 }
 0x10c   :  { %883 = vmatpush3.bf16.msra.mxu1 %v962_v44 }
 0x10d   :  { %884 = vmatprep.subr.bf16.mxu1 %v1037_v0 }
 0x110   :  { %885 = vmatpush3.bf16.msra.mxu1 %v963_v45 }
 0x111   :  { %910 = vmatprep.subr.bf16.mxu1 %v1037_v0 }
 0x1b3   :  { %v233_v34 = vpop.f32.mrf.mxu1 }
 0x1b4   :  { %v234_v35 = vadd.f32 %v720_v33, %v233_v34 }
 0x1b5   :  { %v848_v36 = vpop.f32.mrf.mxu1 }
 0x1b6   :  { %982 = vtanh.f32 %v234_v35 }
 0x1b7   :  { %v236_v37 = vpop.f32.mrf.mxu1 }
 0x1b9   :  { %v849_v38 = vpop.f32.mrf.mxu1 }
 0x1c3   :  { %v983_v39 = vpop.eup %982 }
 0x1c4   :  { %v240_v40 = vpack.c.bf16 %v983_v39, %v983_v39 }
 0x1c6   :  { %867 = vmatmul.mubr.bf16.vlgmr.msra.gmra.mxu0 %v240_v40 }
 0x1c7   :  { %906 = vmatprep.mubr.msk.bf16.mxu0 %vm1038_vm0, %v1037_v0  ;;  %891 = vmatpush3.bf16.msra.mxu0 %v964_v46 }
 0x1c8   :  { %892 = vmatprep.subr.bf16.mxu0 %v1037_v0 }
 0x1cb   :  { %893 = vmatpush3.bf16.msra.mxu0 %v965_v47 }
 0x1cc   :  { %894 = vmatprep.subr.bf16.mxu0 %v1037_v0 }
 0x1cf   :  { %895 = vmatpush3.bf16.msra.mxu0 %v966_v48 }
 0x1d0   :  { %896 = vmatprep.subr.bf16.mxu0 %v1037_v0 }
 0x1d3   :  { %897 = vmatpush3.bf16.msra.mxu0 %v967_v57 }
 0x1d4   :  { %898 = vmatprep.subr.bf16.mxu0 %v1037_v0 }
 0x1d7   :  { %899 = vmatpush3.bf16.msra.mxu0 %v968_v58 }
 0x1d8   :  { %900 = vmatprep.subr.bf16.mxu0 %v1037_v0 }
 0x1db   :  { %901 = vmatpush3.bf16.msra.mxu0 %v969_v59 }
 0x1dc   :  { %902 = vmatprep.subr.bf16.mxu0 %v1037_v0 }
 0x1df   :  { %903 = vmatpush3.bf16.msra.mxu0 %v970_v60 }
 0x1e0   :  { %904 = vmatprep.subr.bf16.mxu0 %v1037_v0 }
 0x1e3   :  { %905 = vmatpush3.bf16.msra.mxu0 %v971_v61 }
 0x286   :  { %v348_v50 = vpop.f32.mrf.mxu0 }
 0x287   :  { %v349_v51 = vadd.f32 %v730_v49, %v348_v50 }
 0x288   :  { %v868_v52 = vpop.f32.mrf.mxu0 }
 0x289   :  { %984 = vtanh.f32 %v349_v51 }
 0x28a   :  { %v351_v53 = vpop.f32.mrf.mxu0 }
 0x28c   :  { %v869_v54 = vpop.f32.mrf.mxu0 }
 0x296   :  { %v985_v55 = vpop.eup %984 }
 0x297   :  { %v355_v56 = vpack.c.bf16 %v985_v55, %v985_v55 }
 0x299   :  { %887 = vmatmul.mubr.bf16.vlgmr.msra.gmra.mxu1 %v355_v56 }
 0x29a   :  { %926 = vmatprep.mubr.msk.bf16.mxu1 %vm1038_vm0, %v1037_v0  ;;  %911 = vmatpush3.bf16.msra.mxu1 %v972_v62 }
 0x29b   :  { %912 = vmatprep.subr.bf16.mxu1 %v1037_v0 }
 0x29e   :  { %913 = vmatpush3.bf16.msra.mxu1 %v973_v63 }
 0x29f   :  { %914 = vmatprep.subr.bf16.mxu1 %v1037_v0 }
 0x2a2   :  { %915 = vmatpush3.bf16.msra.mxu1 %v974_v1 }
 0x2a3   :  { %916 = vmatprep.subr.bf16.mxu1 %v1037_v0 }
 0x2a6   :  { %917 = vmatpush3.bf16.msra.mxu1 %v975_v10 }
 0x2a7   :  { %918 = vmatprep.subr.bf16.mxu1 %v1037_v0 }
 0x2aa   :  { %919 = vmatpush3.bf16.msra.mxu1 %v976_v11 }
 0x2ab   :  { %920 = vmatprep.subr.bf16.mxu1 %v1037_v0 }
 0x2ae   :  { %921 = vmatpush3.bf16.msra.mxu1 %v977_v12 }
 0x2af   :  { %922 = vmatprep.subr.bf16.mxu1 %v1037_v0 }
 0x2b2   :  { %923 = vmatpush3.bf16.msra.mxu1 %v978_v13 }
 0x2b3   :  { %924 = vmatprep.subr.bf16.mxu1 %v1037_v0  ;;  %v759_v0 = vld [vmem:[%s1205_s6] ss:$0 sm:$0xff] }
 0x2b6   :  { %925 = vmatpush3.bf16.msra.mxu1 %v979_v14 }
 0x359   :  { %v463_v3 = vpop.f32.mrf.mxu1 }
 0x35a   :  { %v464_v4 = vadd.f32 %v740_v2, %v463_v3 }
 0x35b   :  { %v888_v5 = vpop.f32.mrf.mxu1 }
 0x35c   :  { %986 = vtanh.f32 %v464_v4 }
 0x35d   :  { %v466_v6 = vpop.f32.mrf.mxu1 }
 0x35f   :  { %v889_v7 = vpop.f32.mrf.mxu1 }
 0x369   :  { %v987_v8 = vpop.eup %986 }
 0x36a   :  { %v470_v9 = vpack.c.bf16 %v987_v8, %v987_v8 }
 0x36c   :  { %907 = vmatmul.mubr.bf16.vlgmr.msra.gmra.mxu0 %v470_v9 }
 0x42c   :  { %v578_v16 = vpop.f32.mrf.mxu0 }
 0x42d   :  { %v579_v17 = vadd.f32 %v750_v15, %v578_v16 }
 0x42e   :  { %v908_v18 = vpop.f32.mrf.mxu0 }
 0x42f   :  { %988 = vtanh.f32 %v579_v17 }
 0x430   :  { %v581_v19 = vpop.f32.mrf.mxu0 }
 0x432   :  { %v909_v20 = vpop.f32.mrf.mxu0 }
 0x43c   :  { %v989_v21 = vpop.eup %988 }
 0x43d   :  { %v585_v22 = vpack.c.bf16 %v989_v21, %v989_v21 }
 0x43f   :  { %927 = vmatmul.mubr.bf16.vlgmr.msra.gmra.mxu1 %v585_v22 }
 0x4ff   :  { %v691_v23 = vpop.f32.mrf.mxu1 }
 0x500   :  { %v692_v24 = vadd.f32 %v759_v0, %v691_v23 }
 0x501   :  { %v928_v25 = vpop.f32.mrf.mxu1 }
 0x502   :  { %698 = vst.msk [vmem:[#allocation5] sm:$0xff] %vm697_vm2, %v692_v24 }
 0x503   :  { %v694_v26 = vpop.f32.mrf.mxu1 }
 0x504   :  { %1021 = shalt.err (!%p1018_p9)
}
 0x505   :  { %708 = dma.vmem_to_hbm [thread:$0]  %s706_s5, 128, %s1206_s7, [#allocation4]   ;;  %v929_v27 = vpop.f32.mrf.mxu1 }
 0x506   :  { %1032 = dma.done.wait [#allocation4], 128  }
 0x507   :  { %1033 = vsyncadd [#allocation4], 4294967168 }
 0x508   :  { %712 = vsyncpa [#allocation3], 1 }
 0x509   :  { %713 = vsyncpa [#allocation4], 1 }

</bundles_post_ra>
